<compile_context>
chip_gen: v6e
topology: v6e:2x2x1
jax: 0.10.0
libtpu: 0.0.40
codegen_flags: <defaults>
</compile_context>

<pallas_src>
import numpy as np
import jax
import jax.numpy as jnp
from jax.experimental import pallas as pl
from jax.experimental.pallas import tpu as pltpu

_LANES = 128


def _pair(v):
    if isinstance(v, (tuple, list)):
        return int(v[0]), int(v[1])
    return int(v), int(v)


def _round_up(v, m):
    return ((v + m - 1) // m) * m


def _make_pool_kernel(kk):
    """Select-by-magnitude over kk window candidates (mul/cmp/select only)."""

    def kernel(w_ref, o_ref):
        # w_ref: (2, kk, TR, 128)   o_ref: (2, TR, 128)
        r0 = w_ref[0, 0]
        i0 = w_ref[1, 0]
        best_m2 = r0 * r0 + i0 * i0
        best_re = r0
        best_im = i0
        # Static unrolled loop over window offsets (row-major, first-max wins,
        # strict '>' keeps the earliest maximum like np.argmax / torch).
        for t in range(1, kk):
            rt = w_ref[0, t]
            it = w_ref[1, t]
            m2 = rt * rt + it * it
            upd = m2 > best_m2
            best_m2 = jnp.where(upd, m2, best_m2)
            best_re = jnp.where(upd, rt, best_re)
            best_im = jnp.where(upd, it, best_im)
        # |z|*(cos th + i sin th) == selected (re, im): write them directly.
        o_ref[0] = best_re
        o_ref[1] = best_im

    return kernel


def complex_max_pool2d(x, kernel_size, stride=None, padding=0, dilation=1,
                       ceil_mode=False, return_indices=False):
    """Pallas-backed equivalent of complexPyTorch complex_max_pool2d.

    x: complex64 array, NCHW (PyTorch convention).  Returns complex64 NCHW.
    """
    if return_indices:
        # TODO(synk): returning flat pooling indices is not implemented.
        raise NotImplementedError("return_indices=True is not supported")
    if ceil_mode:
        # TODO(synk): ceil_mode output-size rounding is not implemented.
        raise NotImplementedError("ceil_mode=True is not supported")

    kh, kw = _pair(kernel_size)
    sh, sw = (kh, kw) if stride is None else _pair(stride)
    ph, pw = _pair(padding)
    dh, dw = _pair(dilation)

    N, C, H, W = x.shape
    xr = jnp.real(x).astype(jnp.float32)
    xi = jnp.imag(x).astype(jnp.float32)
    p = jnp.stack([xr, xi], axis=0)                      # (2, N, C, H, W)
    if ph or pw:
        # Zero-pad: a padded |z|=0 never beats a nonzero candidate, and an
        # all-zero window yields 0 either way -> same values as the reference.
        p = jnp.pad(p, ((0, 0), (0, 0), (0, 0), (ph, ph), (pw, pw)))
    Hp, Wp = H + 2 * ph, W + 2 * pw
    OH = (Hp - dh * (kh - 1) - 1) // sh + 1
    OW = (Wp - dw * (kw - 1) - 1) // sw + 1
    KK = kh * kw
    L = N * C * OH * OW

    # Single layout pass (XLA fuses real/imag split + pad + strided slices +
    # stack + reshape): gather the KK window candidates and flatten the
    # elementwise dims in NCHW order into a lane-dense slab (2, KK, Lrows, 128).
    # For the common stride >= kernel case this duplicates no data.
    # TODO(synk): for overlapping windows this still materializes KK copies in
    # HBM; fusing the window extraction into the kernel would save one HBM pass
    # but cannot keep the flat lane-dense blocking with plain BlockSpec indexing.
    cands = []
    for ih in range(kh):
        for iw in range(kw):
            h0, w0 = ih * dh, iw * dw
            cands.append(
                p[:, :, :, h0:h0 + sh * (OH - 1) + 1:sh,
                            w0:w0 + sw * (OW - 1) + 1:sw])
    wnd = jnp.stack(cands, axis=1)                       # (2, KK, N, C, OH, OW)
    wnd = wnd.reshape(2, KK, L)

    # Tile the flat dim: rows of 128 lanes, TR rows (multiple of 8) per step.
    lrows_needed = pl.cdiv(L, _LANES)
    # Keep the double-buffered resident set (inputs + outputs) under ~24 MiB so
    # it fits v7x's 64 MiB physical VMEM with headroom (fine on v5e/v6e too).
    budget_bytes = 24 * 1024 * 1024
    bytes_per_row_2buf = 2 * (KK + 1) * 2 * _LANES * 4   # re/im, in+out, x2 buffers
    tr_cap = max(8, min(2048, (budget_bytes // bytes_per_row_2buf) // 8 * 8))
    if lrows_needed > tr_cap:
        tr = tr_cap
    elif lrows_needed >= 16:
        # Force >=2 grid steps: DMA/compute overlap and both v7x TensorCores.
        tr = _round_up((lrows_needed + 1) // 2, 8)
    else:
        tr = _round_up(lrows_needed, 8)
    lrows = _round_up(lrows_needed, tr)
    lpad = lrows * _LANES

    wnd = jnp.pad(wnd, ((0, 0), (0, 0), (0, lpad - L)))
    wnd = wnd.reshape(2, KK, lrows, _LANES)

    kernel = _make_pool_kernel(KK)
    out = pl.pallas_call(
        kernel,
        out_shape=jax.ShapeDtypeStruct((2, lrows, _LANES), jnp.float32),
        grid_spec=pltpu.PrefetchScalarGridSpec(
            num_scalar_prefetch=0,
            grid=(lrows // tr,),
            in_specs=[pl.BlockSpec((2, KK, tr, _LANES), lambda r: (0, 0, r, 0))],
            out_specs=pl.BlockSpec((2, tr, _LANES), lambda r: (0, r, 0)),
        ),
        compiler_params=pltpu.CompilerParams(
            dimension_semantics=("parallel",),
            vmem_limit_bytes=32 * 1024 * 1024,
        ),
    )(wnd)

    flat = out.reshape(2, lpad)[:, :L]
    o_re = flat[0].reshape(N, C, OH, OW)                 # already NCHW order
    o_im = flat[1].reshape(N, C, OH, OW)
    return jax.lax.complex(o_re, o_im)                   # complex64, NCHW


class ComplexMaxPool2d:
    """Mirror of the PyTorch module's constructor/forward."""

    def __init__(self, kernel_size, stride=None, padding=0, dilation=1,
                 return_indices=False, ceil_mode=False):
        self.kernel_size = kernel_size
        self.stride = stride
        self.padding = padding
        self.dilation = dilation
        self.ceil_mode = ceil_mode
        self.return_indices = return_indices

    def __call__(self, x):
        return complex_max_pool2d(x, kernel_size=self.kernel_size,
                                  stride=self.stride, padding=self.padding,
                                  dilation=self.dilation,
                                  ceil_mode=self.ceil_mode,
                                  return_indices=self.return_indices)


def _reference_numpy(x, k, s):
    """Straight loop reference of the PyTorch formula (abs-argmax + phase)."""
    x = np.asarray(x)
    N, C, H, W = x.shape
    OH = (H - k) // s + 1
    OW = (W - k) // s + 1
    out = np.zeros((N, C, OH, OW), dtype=np.complex64)
    for n in range(N):
        for c in range(C):
            for oh in range(OH):
                for ow in range(OW):
                    win = x[n, c, oh * s: oh * s + k, ow * s: ow * s + k]
                    mag = np.abs(win)
                    idx = np.unravel_index(np.argmax(mag), mag.shape)
                    m = mag[idx]
                    ang = np.arctan2(win[idx].imag, win[idx].real)
                    out[n, c, oh, ow] = m * np.cos(ang) + 1j * m * np.sin(ang)
    return out


if __name__ == "__main__":
    key = jax.random.PRNGKey(0)
    kr, ki = jax.random.split(key)
    N, C, H, W = 2, 4, 16, 16
    x_re = jax.random.normal(kr, (N, C, H, W), dtype=jnp.float32)
    x_im = jax.random.normal(ki, (N, C, H, W), dtype=jnp.float32)
    x = (x_re + 1j * x_im).astype(jnp.complex64)

    pool = ComplexMaxPool2d(kernel_size=2)   # stride=None -> stride=2
    out = pool(x)
    out = jax.block_until_ready(out)

    ref = _reference_numpy(np.asarray(x), k=2, s=2)
    assert out.shape == ref.shape == (N, C, H // 2, W // 2), out.shape
    assert np.allclose(np.asarray(out), ref, atol=1e-4, rtol=1e-4)

    print("KERNEL_OK")
</pallas_src>

<mosaic_0001>
module attributes {stable_mosaic.version = 11 : i64} {
  func.func @kernel(%arg0: i32, %arg1: memref<2x4x8x128xf32, #tpu.memory_space<vmem>>, %arg2: memref<2x8x128xf32, #tpu.memory_space<vmem>>) attributes {dimension_semantics = [#tpu.dimension_semantics<parallel>], iteration_bounds = array<i64: 1>, scalar_prefetch = 0 : i64, scratch_operands = 0 : i64, tpu.core_type = #tpu.core_type<tc>, window_params = [{transform_indices = @transform_0, window_bounds = array<i64: 2, 4, 8, 128>}, {transform_indices = @transform_1, window_bounds = array<i64: 2, 8, 128>}]} {
    %c0 = arith.constant 0 : index
    %c0_0 = arith.constant 0 : index
    %c0_1 = arith.constant 0 : index
    %c0_2 = arith.constant 0 : index
    %0 = vector.load %arg1[%c0, %c0_0, %c0_1, %c0_2] : memref<2x4x8x128xf32, #tpu.memory_space<vmem>>, vector<1x1x8x128xf32>
    %1 = vector.shape_cast %0 : vector<1x1x8x128xf32> to vector<8x128xf32>
    %c1 = arith.constant 1 : index
    %c0_3 = arith.constant 0 : index
    %c0_4 = arith.constant 0 : index
    %c0_5 = arith.constant 0 : index
    %2 = vector.load %arg1[%c1, %c0_3, %c0_4, %c0_5] : memref<2x4x8x128xf32, #tpu.memory_space<vmem>>, vector<1x1x8x128xf32>
    %3 = vector.shape_cast %2 : vector<1x1x8x128xf32> to vector<8x128xf32>
    %4 = arith.mulf %1, %1 : vector<8x128xf32>
    %5 = arith.mulf %3, %3 : vector<8x128xf32>
    %6 = arith.addf %4, %5 : vector<8x128xf32>
    %c0_6 = arith.constant 0 : index
    %c1_7 = arith.constant 1 : index
    %c0_8 = arith.constant 0 : index
    %c0_9 = arith.constant 0 : index
    %7 = vector.load %arg1[%c0_6, %c1_7, %c0_8, %c0_9] : memref<2x4x8x128xf32, #tpu.memory_space<vmem>>, vector<1x1x8x128xf32>
    %8 = vector.shape_cast %7 : vector<1x1x8x128xf32> to vector<8x128xf32>
    %c1_10 = arith.constant 1 : index
    %c1_11 = arith.constant 1 : index
    %c0_12 = arith.constant 0 : index
    %c0_13 = arith.constant 0 : index
    %9 = vector.load %arg1[%c1_10, %c1_11, %c0_12, %c0_13] : memref<2x4x8x128xf32, #tpu.memory_space<vmem>>, vector<1x1x8x128xf32>
    %10 = vector.shape_cast %9 : vector<1x1x8x128xf32> to vector<8x128xf32>
    %11 = arith.mulf %8, %8 : vector<8x128xf32>
    %12 = arith.mulf %10, %10 : vector<8x128xf32>
    %13 = arith.addf %11, %12 : vector<8x128xf32>
    %14 = arith.cmpf ogt, %13, %6 : vector<8x128xf32>
    %15 = arith.select %14, %13, %6 : vector<8x128xi1>, vector<8x128xf32>
    %16 = arith.select %14, %8, %1 : vector<8x128xi1>, vector<8x128xf32>
    %17 = arith.select %14, %10, %3 : vector<8x128xi1>, vector<8x128xf32>
    %c0_14 = arith.constant 0 : index
    %c2 = arith.constant 2 : index
    %c0_15 = arith.constant 0 : index
    %c0_16 = arith.constant 0 : index
    %18 = vector.load %arg1[%c0_14, %c2, %c0_15, %c0_16] : memref<2x4x8x128xf32, #tpu.memory_space<vmem>>, vector<1x1x8x128xf32>
    %19 = vector.shape_cast %18 : vector<1x1x8x128xf32> to vector<8x128xf32>
    %c1_17 = arith.constant 1 : index
    %c2_18 = arith.constant 2 : index
    %c0_19 = arith.constant 0 : index
    %c0_20 = arith.constant 0 : index
    %20 = vector.load %arg1[%c1_17, %c2_18, %c0_19, %c0_20] : memref<2x4x8x128xf32, #tpu.memory_space<vmem>>, vector<1x1x8x128xf32>
    %21 = vector.shape_cast %20 : vector<1x1x8x128xf32> to vector<8x128xf32>
    %22 = arith.mulf %19, %19 : vector<8x128xf32>
    %23 = arith.mulf %21, %21 : vector<8x128xf32>
    %24 = arith.addf %22, %23 : vector<8x128xf32>
    %25 = arith.cmpf ogt, %24, %15 : vector<8x128xf32>
    %26 = arith.select %25, %24, %15 : vector<8x128xi1>, vector<8x128xf32>
    %27 = arith.select %25, %19, %16 : vector<8x128xi1>, vector<8x128xf32>
    %28 = arith.select %25, %21, %17 : vector<8x128xi1>, vector<8x128xf32>
    %c0_21 = arith.constant 0 : index
    %c3 = arith.constant 3 : index
    %c0_22 = arith.constant 0 : index
    %c0_23 = arith.constant 0 : index
    %29 = vector.load %arg1[%c0_21, %c3, %c0_22, %c0_23] : memref<2x4x8x128xf32, #tpu.memory_space<vmem>>, vector<1x1x8x128xf32>
    %30 = vector.shape_cast %29 : vector<1x1x8x128xf32> to vector<8x128xf32>
    %c1_24 = arith.constant 1 : index
    %c3_25 = arith.constant 3 : index
    %c0_26 = arith.constant 0 : index
    %c0_27 = arith.constant 0 : index
    %31 = vector.load %arg1[%c1_24, %c3_25, %c0_26, %c0_27] : memref<2x4x8x128xf32, #tpu.memory_space<vmem>>, vector<1x1x8x128xf32>
    %32 = vector.shape_cast %31 : vector<1x1x8x128xf32> to vector<8x128xf32>
    %33 = arith.mulf %30, %30 : vector<8x128xf32>
    %34 = arith.mulf %32, %32 : vector<8x128xf32>
    %35 = arith.addf %33, %34 : vector<8x128xf32>
    %36 = arith.cmpf ogt, %35, %26 : vector<8x128xf32>
    %37 = arith.select %36, %30, %27 : vector<8x128xi1>, vector<8x128xf32>
    %38 = arith.select %36, %32, %28 : vector<8x128xi1>, vector<8x128xf32>
    %c0_28 = arith.constant 0 : index
    %c0_29 = arith.constant 0 : index
    %c0_30 = arith.constant 0 : index
    %39 = vector.load %arg2[%c0_28, %c0_29, %c0_30] : memref<2x8x128xf32, #tpu.memory_space<vmem>>, vector<1x8x128xf32>
    %40 = vector.shape_cast %39 : vector<1x8x128xf32> to vector<8x128xf32>
    %41 = vector.shape_cast %37 : vector<8x128xf32> to vector<1x8x128xf32>
    tpu.vector_store %arg2[%c0_28, %c0_29, %c0_30], %41 {strides = array<i32>} : memref<2x8x128xf32, #tpu.memory_space<vmem>>, vector<1x8x128xf32>,
    %c1_31 = arith.constant 1 : index
    %c0_32 = arith.constant 0 : index
    %c0_33 = arith.constant 0 : index
    %42 = vector.load %arg2[%c1_31, %c0_32, %c0_33] : memref<2x8x128xf32, #tpu.memory_space<vmem>>, vector<1x8x128xf32>
    %43 = vector.shape_cast %42 : vector<1x8x128xf32> to vector<8x128xf32>
    %44 = vector.shape_cast %38 : vector<8x128xf32> to vector<1x8x128xf32>
    tpu.vector_store %arg2[%c1_31, %c0_32, %c0_33], %44 {strides = array<i32>} : memref<2x8x128xf32, #tpu.memory_space<vmem>>, vector<1x8x128xf32>,
    return
  }
  func.func @transform_0(%arg0: i32) -> (i32, i32, i32, i32) {
    %c0_i32 = arith.constant 0 : i32
    %c0_i32_0 = arith.constant 0 : i32
    %c0_i32_1 = arith.constant 0 : i32
    %c0_i32_2 = arith.constant 0 : i32
    return %c0_i32, %c0_i32_0, %arg0, %c0_i32_1 : i32, i32, i32, i32
  }
  func.func @transform_1(%arg0: i32) -> (i32, i32, i32) {
    %c0_i32 = arith.constant 0 : i32
    %c0_i32_0 = arith.constant 0 : i32
    %c0_i32_1 = arith.constant 0 : i32
    return %c0_i32, %arg0, %c0_i32_0 : i32, i32, i32
  }
}

</mosaic_0001>

<bundles_post_ra>
// kernel: tpu_custom_call.1
= control target key start
LH: loop header
LB: loop body
LE: loop exit
PB: predicated region body
PF: predicated region fallthrough
CT: control target
= control target key end

     0   :  { %6 = vsyncpa [#allocation3], 0  ;;  %s155_s0 = inlined_call_operand.hbm [shape: f32[2,4,8,128], index: 0, kind: input, shape index: {}]   ;;  %s156_s1 = inlined_call_operand.hbm [shape: f32[2,8,128], index: 1, kind: output, shape index: {}]  }
   0x1   :  { %7 = vsyncpa [#allocation4], 0  ;;  %s129_s6 = smov [#allocation2]  }
   0x2   :  { %s13_s7 = sshll.u32 %s129_s6, 4  ;;  %s14_s7 = int_to_ptr.vmem [resolvable:$true] %s13_s7 }
   0x3   :  { %s93_s8 = scalar_lea.vmem %s14_s7, 1024  ;;  %p98_p1 = scmp.lt.s32.totalorder %s14_s7, %s14_s7 }
   0x4   :  { %p94_p0 = scmp.ne.s32.totalorder %s14_s7, %s93_s8  ;;  %p99_p2 = scmp.lt.s32.totalorder %s93_s8, %s93_s8 }
   0x6   :  { %p100_p3 = por %p99_p2, %p98_p1 }
   0x8   :  { %p101_p4 = pnand %p100_p3, %p94_p0 }
   0xa   :  { %104 = shalt.err (!%p101_p4)
}
   0xb   :  { %s130_s9 = smov 128   ;;  %s131_s10 = smov 8  }
   0xc   :  { %19 = dma.hbm_to_vmem [thread:$0]  %s155_s0, 1024, %s14_s7, [#allocation3], %s130_s9, %s130_s9, %s131_s10  }
   0xd   :  { %125 = dma.done.wait [#allocation3], 1024  }
   0xe   :  { %126 = vsyncadd [#allocation3], 4294966272  ;;  %v23_v0 = vld [vmem:[#allocation2] sm:$0xff]  ;;  %v30_v2 = vld [vmem:[#allocation2 + $0x8] sm:$0xff]  ;;  %s132_s0 = smov [#allocation5]  }
   0xf   :  { %v25_v1 = vld [vmem:[#allocation2 + $0x20] sm:$0xff]  ;;  %v26_v3 = vmul.f32 %v23_v0, %v23_v0  ;;  %v32_v5 = vld [vmem:[#allocation2 + $0x28] sm:$0xff]  ;;  %v33_v6 = vmul.f32 %v30_v2, %v30_v2  ;;  %v41_v7 = vld [vmem:[#allocation2 + $0x10] sm:$0xff]  ;;  %s69_s13 = sshll.u32 %s132_s0, 4  ;;  %s70_s13 = int_to_ptr.vmem [resolvable:$true] %s69_s13 }
  0x10   :  { %v27_v4 = vmul.f32 %v25_v1, %v25_v1  ;;  %v43_v8 = vld [vmem:[#allocation2 + $0x30] sm:$0xff]  ;;  %v34_v9 = vmul.f32 %v32_v5, %v32_v5  ;;  %v44_v10 = vmul.f32 %v41_v7, %v41_v7  ;;  %v52_v12 = vld [vmem:[#allocation2 + $0x18] sm:$0xff]  ;;  %s105_s14 = scalar_lea.vmem %s70_s13, 256  ;;  %p110_p6 = scmp.lt.s32.totalorder %s70_s13, %s70_s13 }
  0x11   :  { %v45_v11 = vmul.f32 %v43_v8, %v43_v8  ;;  %v54_v13 = vld [vmem:[#allocation2 + $0x38] sm:$0xff]  ;;  %v55_v15 = vmul.f32 %v52_v12, %v52_v12  ;;  %p106_p5 = scmp.ne.s32.totalorder %s70_s13, %s105_s14  ;;  %p111_p7 = scmp.lt.s32.totalorder %s105_s14, %s105_s14 }
  0x12   :  { %v28_v14 = vadd.f32 %v27_v4, %v26_v3  ;;  %v56_v16 = vmul.f32 %v54_v13, %v54_v13  ;;  %v35_v17 = vadd.f32 %v34_v9, %v33_v6 }
  0x13   :  { %v46_v18 = vadd.f32 %v45_v11, %v44_v10  ;;  %p112_p8 = por %p111_p7, %p110_p6 }
  0x14   :  { %vm36_vm0 = vcmp.gt.f32.partialorder %v35_v17, %v28_v14  ;;  %v57_v19 = vadd.f32 %v56_v16, %v55_v15 }
  0x15   :  { %v37_v20 = vsel %vm36_vm0, %v35_v17, %v28_v14  ;;  %v38_v21 = vsel %vm36_vm0, %v30_v2, %v23_v0  ;;  %v39_v22 = vsel %vm36_vm0, %v32_v5, %v25_v1  ;;  %p113_p9 = pnand %p112_p8, %p106_p5 }
  0x16   :  { %vm47_vm1 = vcmp.gt.f32.partialorder %v46_v18, %v37_v20 }
  0x17   :  { %v48_v23 = vsel %vm47_vm1, %v46_v18, %v37_v20  ;;  %v49_v24 = vsel %vm47_vm1, %v41_v7, %v38_v21  ;;  %v50_v25 = vsel %vm47_vm1, %v43_v8, %v39_v22 }
  0x18   :  { %vm58_vm2 = vcmp.gt.f32.partialorder %v57_v19, %v48_v23 }
  0x19   :  { %v59_v26 = vsel %vm58_vm2, %v52_v12, %v49_v24  ;;  %v60_v27 = vsel %vm58_vm2, %v54_v13, %v50_v25 }
  0x1a   :  { %61 = vst [vmem:[#allocation5] sm:$0xff] %v59_v26  ;;  %63 = vst [vmem:[#allocation5 + $0x8] sm:$0xff] %v60_v27 }
  0x1b   :  { %116 = shalt.err (!%p113_p9)
}
  0x1c   :  { %75 = dma.vmem_to_hbm [thread:$0]  %s70_s13, 256, %s156_s1, [#allocation4], %s130_s9, %s130_s9, %s131_s10  }
  0x1d   :  { %127 = dma.done.wait [#allocation4], 256  }
  0x1e   :  { %128 = vsyncadd [#allocation4], 4294967040 }
  0x1f   :  { %79 = vsyncpa [#allocation3], 1 }
  0x20   :  { %80 = vsyncpa [#allocation4], 1 }

</bundles_post_ra>
